<compile_context>
chip_gen: v5e
topology: v5e:2x2
jax: 0.10.0
libtpu: 0.0.40
codegen_flags: <defaults>
</compile_context>

<pallas_src>
import functools
import math
from collections import namedtuple

import jax
import jax.numpy as jnp
from jax import lax
from jax.experimental import pallas as pl
from jax.experimental.pallas import tpu as pltpu

VariationalAutoencoderLossDetails = namedtuple(
    "VariationalAutoencoderLossDetails",
    ["loss", "rec_loss", "dist_loss", "weighted_dist_loss"],
)

_LANES = 128
_SUBLANES = 8
# Per-input block budget in lane-padded elements: 4096x128 f32 = 2 MiB/block
# -> 2 inputs x 2 pipeline buffers x 2 MiB = 8 MiB, well under the 32 MiB scoped
# VMEM we request explicitly (v7x: 64 MiB physical / 32 MiB scoped budget).
_MAX_BLOCK_ELEMS = 4096 * _LANES
_VMEM_LIMIT_BYTES = 32 * 1024 * 1024


def _masked_mse_partial_kernel(
    length_ref,            # SMEM scalar prefetch: (B,) f32 relative lengths
    a_ref, b_ref,          # VMEM blocks (1, rows_per_tile, cols), native dtype
    out_ref,               # VMEM block  (1, 8, cols) f32: per-program partial sums
    *, time_len, feat, numel, cols, rows_per_tile, chunk_rows, small_path,
):
    bi = pl.program_id(0)
    ti = pl.program_id(1)

    rel_len = length_ref[bi]
    # Reference keeps time step t iff t < rel_len * T (float compare on integer t),
    # which is exactly: flat element index < ceil(rel_len * T) * feat.
    thr = jnp.ceil(rel_len * time_len).astype(jnp.int32) * feat
    # Clamp to numel: matches reference for rel_len > 1 and also zeroes the garbage
    # rows of a partial (out-of-bounds) last row-tile.
    thr = jnp.minimum(thr, numel)

    if small_path:
        # Tiny / irregular tensors (row count below the sublane granule): one block.
        a = a_ref[0].astype(jnp.float32)
        b = b_ref[0].astype(jnp.float32)
        d = a - b
        v = d * d
        flat = (lax.broadcasted_iota(jnp.int32, v.shape, 0) * cols
                + lax.broadcasted_iota(jnp.int32, v.shape, 1))
        v = jnp.where(flat < thr, v, 0.0)
        s = jnp.sum(v, axis=0, keepdims=True)                      # (1, cols)
        rowsel = lax.broadcasted_iota(jnp.int32, (_SUBLANES, cols), 0)
        out_ref[0] = jnp.where(rowsel == 0, s, 0.0)                # row 0 holds the partial
        return

    # Chunked path: fold the tile/chunk base into a scalar threshold so the per-vreg
    # mask cost is one compare + one select against a hoisted constant iota.
    thr_local = thr - ti * (rows_per_tile * cols)                  # scalar int32
    flat_chunk = (lax.broadcasted_iota(jnp.int32, (chunk_rows, cols), 0) * cols
                  + lax.broadcasted_iota(jnp.int32, (chunk_rows, cols), 1))

    n_chunks = rows_per_tile // chunk_rows

    def body(ci, acc):
        r0 = pl.multiple_of(ci * chunk_rows, chunk_rows)
        a = a_ref[0, pl.ds(r0, chunk_rows), :].astype(jnp.float32)
        b = b_ref[0, pl.ds(r0, chunk_rows), :].astype(jnp.float32)
        d = a - b
        v = d * d
        v = jnp.where(flat_chunk < (thr_local - r0 * cols), v, 0.0)
        return acc + v

    acc = lax.fori_loop(0, n_chunks, body,
                        jnp.zeros((chunk_rows, cols), jnp.float32))

    # Fold (chunk_rows, cols) -> (8, cols) with static sublane-aligned slices (pure VPU adds).
    partial = jnp.zeros((_SUBLANES, cols), jnp.float32)
    for g in range(chunk_rows // _SUBLANES):
        partial = partial + acc[g * _SUBLANES:(g + 1) * _SUBLANES, :]
    out_ref[0] = partial


def _rec_partial_sums(targets, rec, length):
    """Length-masked per-(batch, row-tile) partial sums of (targets - rec)**2.

    Returns (B, n_tiles * 8, cols) f32 whose total sum equals
    sum((targets - rec)**2 * length_mask).
    """
    assert targets.shape == rec.shape and targets.ndim >= 2
    B = targets.shape[0]
    time_len = targets.shape[1]
    feat = int(math.prod(targets.shape[2:]))
    numel = time_len * feat
    assert numel < 2 ** 30, "per-item element count too large for int32 flat indexing"

    # Free (no-copy) 3-D view: lane-dense when the flat size divides 128, else natural.
    if numel % _LANES == 0:
        rows, cols = numel // _LANES, _LANES
    else:
        rows, cols = time_len, feat

    a3 = targets.reshape(B, rows, cols)
    b3 = rec.reshape(B, rows, cols)

    # Sublane granule from the narrowest input dtype: (8,128) f32, (16,128) bf16, (32,128) 8-bit.
    def _granule(dt):
        return max(_SUBLANES, 32 // max(1, jnp.dtype(dt).itemsize))

    granule = max(_granule(targets.dtype), _granule(rec.dtype))
    cols_padded = -(-cols // _LANES) * _LANES          # lane-padded width in VMEM

    small_path = rows < granule
    if small_path:
        rows_per_tile, n_tiles, chunk_rows = rows, 1, rows
    else:
        rows_cap = max(granule,
                       (_MAX_BLOCK_ELEMS // cols_padded) // granule * granule)
        rows_per_tile = min(rows_cap, rows // granule * granule)
        n_tiles = -(-rows // rows_per_tile)
        # v7x megacore: make sure there are >= 2 programs so both TensorCores get work.
        if B * n_tiles < 2 and rows_per_tile >= 2 * granule:
            rows_per_tile = (rows_per_tile // 2) // granule * granule
            n_tiles = -(-rows // rows_per_tile)
        # In-kernel chunk: multiple of the granule, divides rows_per_tile, and keeps the
        # per-iteration live values to <= 64x128 elements per input (~8 f32 vregs).
        chunk_rows = granule
        while (chunk_rows * 2 <= min(rows_per_tile, 64)
               and rows_per_tile % (chunk_rows * 2) == 0
               and (chunk_rows * 2) * cols_padded <= 64 * _LANES):
            chunk_rows *= 2

    kernel = functools.partial(
        _masked_mse_partial_kernel,
        time_len=time_len, feat=feat, numel=numel, cols=cols,
        rows_per_tile=rows_per_tile, chunk_rows=chunk_rows, small_path=small_path,
    )

    grid_spec = pltpu.PrefetchScalarGridSpec(
        num_scalar_prefetch=1,                     # `length` lives in SMEM
        grid=(B, n_tiles),
        in_specs=[
            pl.BlockSpec((1, rows_per_tile, cols), lambda bi, ti, L: (bi, ti, 0)),
            pl.BlockSpec((1, rows_per_tile, cols), lambda bi, ti, L: (bi, ti, 0)),
        ],
        out_specs=pl.BlockSpec((1, _SUBLANES, cols), lambda bi, ti, L: (bi, ti, 0)),
    )

    block_bytes = rows_per_tile * cols_padded * (
        targets.dtype.itemsize + rec.dtype.itemsize)
    vmem_limit = max(_VMEM_LIMIT_BYTES, 3 * block_bytes)

    return pl.pallas_call(
        kernel,
        grid_spec=grid_spec,
        out_shape=jax.ShapeDtypeStruct((B, n_tiles * _SUBLANES, cols), jnp.float32),
        compiler_params=pltpu.CompilerParams(
            # Every program writes its own partial-sum block -> both axes parallel
            # (megacore sharding on v7x).
            dimension_semantics=("parallel", "parallel"),
            vmem_limit_bytes=vmem_limit,
        ),
    )(length, a3, b3)


def _kl_divergence_sum(mean, log_var, length):
    # Latent tensors are tiny; a second pallas_call is pure launch overhead (per perf review),
    # so the KL term is computed in plain JAX and fused by XLA.
    time_len = mean.shape[1]
    m = mean.astype(jnp.float32)
    lv = log_var.astype(jnp.float32)
    elem = -0.5 * (1.0 + lv - m * m - jnp.exp(lv))
    mask = (jnp.arange(time_len, dtype=jnp.float32)[None, :]
            < (length * time_len)[:, None]).astype(jnp.float32)
    mask = mask.reshape(mask.shape + (1,) * (elem.ndim - 2))
    return jnp.sum(elem * mask)


@functools.partial(jax.jit, static_argnames=("dist_loss_weight",))
def _vae_loss_details_impl(rec, mean, log_var, targets, length, dist_loss_weight):
    B = targets.shape[0]
    length = jnp.asarray(length, jnp.float32)
    rec_part = _rec_partial_sums(targets, rec, length)
    rec_loss = jnp.sum(rec_part) / B
    dist_loss = _kl_divergence_sum(mean, log_var, length) / B
    weighted_dist_loss = dist_loss_weight * dist_loss
    loss = rec_loss + weighted_dist_loss
    return VariationalAutoencoderLossDetails(loss, rec_loss, dist_loss, weighted_dist_loss)


def vae_loss_details(rec, mean, log_var, targets, length=None, dist_loss_weight=0.001):
    """Pallas implementation of VariationalAutoencoderLoss.details (reduction='batchmean')."""
    if length is None:
        length = jnp.ones((targets.shape[0],), jnp.float32)
    return _vae_loss_details_impl(rec, mean, log_var, targets, length,
                                  float(dist_loss_weight))


def vae_loss_forward(rec, mean, log_var, targets, length=None, dist_loss_weight=0.001):
    """forward() of the module: returns just the combined loss (batchmean reduction)."""
    return vae_loss_details(rec, mean, log_var, targets, length, dist_loss_weight).loss


# --------------------------------------------------------------------------------------
# Pure-JAX reference (mirrors the PyTorch module) + self-checks.
# --------------------------------------------------------------------------------------
def _reference_details(rec, mean, log_var, targets, length, w):
    B = targets.shape[0]
    T = targets.shape[1]
    Tl = mean.shape[1]
    tgt32, rec32 = targets.astype(jnp.float32), rec.astype(jnp.float32)
    m32, lv32 = mean.astype(jnp.float32), log_var.astype(jnp.float32)
    rec_elem = (tgt32 - rec32) ** 2
    dist_elem = -0.5 * (1.0 + lv32 - m32 ** 2 - jnp.exp(lv32))

    def msk(t_len, ndim):
        m = (jnp.arange(t_len, dtype=jnp.float32)[None, :]
             < (length * t_len)[:, None]).astype(jnp.float32)
        return m.reshape(m.shape + (1,) * (ndim - 2))

    rec_loss = jnp.sum(rec_elem * msk(T, rec_elem.ndim)) / B
    dist_loss = jnp.sum(dist_elem * msk(Tl, dist_elem.ndim)) / B
    return rec_loss + w * dist_loss, rec_loss, dist_loss


def _check(details, ref, rtol=1e-5, atol=1e-5):
    ref_loss, ref_rec, ref_dist = ref
    assert jnp.allclose(details.loss, ref_loss, rtol=rtol, atol=atol), (details.loss, ref_loss)
    assert jnp.allclose(details.rec_loss, ref_rec, rtol=rtol, atol=atol), (details.rec_loss, ref_rec)
    assert jnp.allclose(details.dist_loss, ref_dist, rtol=rtol, atol=atol), (details.dist_loss, ref_dist)


if __name__ == "__main__":
    key = jax.random.PRNGKey(0)
    k1, k2, k3, k4, k5, k6, k7, k8 = jax.random.split(key, 8)
    w = 0.001

    # Case 1 & 2: base shapes [batch=2, time=8, feat=32], latent [2, 8, 16];
    # lane-dense small-tile path; full and variable lengths.
    B, T, F = 2, 8, 32
    Tl, D = 8, 16
    targets = jax.random.normal(k1, (B, T, F), jnp.float32)
    rec = jax.random.normal(k2, (B, T, F), jnp.float32)
    mean = jax.random.normal(k3, (B, Tl, D), jnp.float32)
    log_var = 0.5 * jax.random.normal(k4, (B, Tl, D), jnp.float32)

    length_full = jnp.ones((B,), jnp.float32)
    d1 = vae_loss_details(rec, mean, log_var, targets, length_full, w)
    jax.block_until_ready(d1.loss)
    _check(d1, _reference_details(rec, mean, log_var, targets, length_full, w))

    length_var = jnp.array([1.0, 0.5], jnp.float32)
    d2 = vae_loss_details(rec, mean, log_var, targets, length_var, w)
    jax.block_until_ready(d2.loss)
    _check(d2, _reference_details(rec, mean, log_var, targets, length_var, w))

    # Case 3: lane-dense chunked multi-tile path with a partial last row-tile.
    T3, F3 = 72, 80
    targets3 = jax.random.normal(k5, (B, T3, F3), jnp.float32)
    rec3 = jax.random.normal(k6, (B, T3, F3), jnp.float32)
    length3 = jnp.array([0.9, 0.3], jnp.float32)
    d3 = vae_loss_details(rec3, mean, log_var, targets3, length3, w)
    jax.block_until_ready(d3.loss)
    _check(d3, _reference_details(rec3, mean, log_var, targets3, length3, w),
           rtol=1e-4, atol=1e-4)

    # Case 4: natural (T, feat) layout (numel % 128 != 0), chunked path + partial tile,
    # plus a small natural-layout case.
    T4, F4 = 33, 24
    targets4 = jax.random.normal(k7, (B, T4, F4), jnp.float32)
    rec4 = jax.random.normal(k8, (B, T4, F4), jnp.float32)
    length4 = jnp.array([0.8, 0.4], jnp.float32)
    d4 = vae_loss_details(rec4, mean, log_var, targets4, length4, w)
    jax.block_until_ready(d4.loss)
    _check(d4, _reference_details(rec4, mean, log_var, targets4, length4, w),
           rtol=1e-4, atol=1e-4)

    T5, F5 = 7, 24
    targets5 = jax.random.normal(k1, (B, T5, F5), jnp.float32)
    rec5 = jax.random.normal(k2, (B, T5, F5), jnp.float32)
    d5 = vae_loss_details(rec5, mean, log_var, targets5, length4, w)
    jax.block_until_ready(d5.loss)
    _check(d5, _reference_details(rec5, mean, log_var, targets5, length4, w))

    # Case 5: bf16 inputs flow into the kernel in their native dtype (16-row granule).
    T6, F6 = 64, 128
    targets6 = jax.random.normal(k3, (B, T6, F6), jnp.float32).astype(jnp.bfloat16)
    rec6 = jax.random.normal(k4, (B, T6, F6), jnp.float32).astype(jnp.bfloat16)
    mean6 = mean.astype(jnp.bfloat16)
    log_var6 = log_var.astype(jnp.bfloat16)
    length6 = jnp.array([1.0, 0.7], jnp.float32)
    d6 = vae_loss_details(rec6, mean6, log_var6, targets6, length6, w)
    jax.block_until_ready(d6.loss)
    _check(d6, _reference_details(rec6, mean6, log_var6, targets6, length6, w),
           rtol=2e-4, atol=1e-2)

    # Case 6: the module's doctest (2-D tensors, dist_loss_weight=0.5, length=None).
    rec_dt = jnp.array([[0.8, 1.0], [1.2, 0.6], [0.4, 1.4]], jnp.float32)
    mean_dt = jnp.array([[0.5, 1.0], [1.5, 1.0], [1.0, 1.4]], jnp.float32)
    lv_dt = jnp.array([[0.0, -0.2], [2.0, -2.0], [0.2, 0.4]], jnp.float32)
    tgt_dt = jnp.array([[0.9, 1.1], [1.4, 0.6], [0.2, 1.4]], jnp.float32)
    d7 = vae_loss_details(rec_dt, mean_dt, lv_dt, tgt_dt, None, 0.5)
    jax.block_until_ready(d7.loss)
    ones3 = jnp.ones((3,), jnp.float32)
    _check(d7, _reference_details(rec_dt, mean_dt, lv_dt, tgt_dt, ones3, 0.5))
    assert jnp.allclose(d7.loss, 1.1264, atol=1e-3)
    assert jnp.allclose(d7.rec_loss, 0.0333, atol=1e-3)
    assert jnp.allclose(d7.dist_loss, 2.1861, atol=1e-3)

    # forward() entry point (length=None -> all-ones mask).
    loss = vae_loss_forward(rec, mean, log_var, targets)
    jax.block_until_ready(loss)

    print("KERNEL_OK")
</pallas_src>

<mosaic_0001>
module attributes {stable_mosaic.version = 11 : i64} {
  func.func @_masked_mse_partial_kernel(%arg0: i32, %arg1: i32, %arg2: memref<2xf32, #tpu.memory_space<smem>>, %arg3: memref<1x2x128xf32, #tpu.memory_space<vmem>>, %arg4: memref<1x2x128xf32, #tpu.memory_space<vmem>>, %arg5: memref<1x8x128xf32, #tpu.memory_space<vmem>>) attributes {dimension_semantics = [#tpu.dimension_semantics<parallel>, #tpu.dimension_semantics<parallel>], iteration_bounds = array<i64: 2, 1>, scalar_prefetch = 1 : i64, scratch_operands = 0 : i64, tpu.core_type = #tpu.core_type<tc>, window_params = [{transform_indices = @transform_0, window_bounds = array<i64: 1, 2, 128>}, {transform_indices = @transform_1, window_bounds = array<i64: 1, 2, 128>}, {transform_indices = @transform_2, window_bounds = array<i64: 1, 8, 128>}]} {
    %0 = arith.index_cast %arg0 : i32 to index
    %1 = memref.load %arg2[%0] : memref<2xf32, #tpu.memory_space<smem>>
    %cst = arith.constant 8.000000e+00 : f32
    %2 = arith.mulf %1, %cst : f32
    %3 = math.ceil %2 : f32
    %4 = arith.fptosi %3 : f32 to i32
    %c32_i32 = arith.constant 32 : i32
    %5 = arith.muli %4, %c32_i32 : i32
    %c256_i32 = arith.constant 256 : i32
    %6 = arith.minsi %5, %c256_i32 : i32
    %c0 = arith.constant 0 : index
    %c0_0 = arith.constant 0 : index
    %c0_1 = arith.constant 0 : index
    %7 = vector.load %arg3[%c0, %c0_0, %c0_1] : memref<1x2x128xf32, #tpu.memory_space<vmem>>, vector<1x2x128xf32>
    %8 = vector.shape_cast %7 : vector<1x2x128xf32> to vector<2x128xf32>
    %c0_2 = arith.constant 0 : index
    %c0_3 = arith.constant 0 : index
    %c0_4 = arith.constant 0 : index
    %9 = vector.load %arg4[%c0_2, %c0_3, %c0_4] : memref<1x2x128xf32, #tpu.memory_space<vmem>>, vector<1x2x128xf32>
    %10 = vector.shape_cast %9 : vector<1x2x128xf32> to vector<2x128xf32>
    %11 = arith.subf %8, %10 : vector<2x128xf32>
    %12 = arith.mulf %11, %11 : vector<2x128xf32>
    %13 = tpu.iota {dimensions = array<i32: 0>} : vector<2x128xi32>
    %c128_i32 = arith.constant 128 : i32
    %14 = vector.broadcast %c128_i32 : i32 to vector<2x128xi32>
    %15 = arith.muli %13, %14 : vector<2x128xi32>
    %16 = tpu.iota {dimensions = array<i32: 1>} : vector<2x128xi32>
    %17 = arith.addi %15, %16 : vector<2x128xi32>
    %18 = vector.broadcast %6 : i32 to vector<2x128xi32>
    %19 = arith.cmpi slt, %17, %18 : vector<2x128xi32>
    %cst_5 = arith.constant 0.000000e+00 : f32
    %20 = vector.broadcast %cst_5 : f32 to vector<2x128xf32>
    %21 = arith.select %19, %12, %20 : vector<2x128xi1>, vector<2x128xf32>
    %cst_6 = arith.constant dense<0.000000e+00> : vector<128xf32>
    %22 = vector.multi_reduction <add>, %21, %cst_6 [0] : vector<2x128xf32> to vector<128xf32>
    %23 = vector.shape_cast %22 : vector<128xf32> to vector<1x128xf32>
    %24 = tpu.iota {dimensions = array<i32: 0>} : vector<8x128xi32>
    %c0_i32 = arith.constant 0 : i32
    %25 = vector.broadcast %c0_i32 : i32 to vector<8x128xi32>
    %26 = arith.cmpi eq, %24, %25 : vector<8x128xi32>
    %cst_7 = arith.constant 0.000000e+00 : f32
    %27 = vector.shape_cast %23 : vector<1x128xf32> to vector<1x128xf32>
    %28 = vector.broadcast %27 : vector<1x128xf32> to vector<8x128xf32>
    %29 = vector.broadcast %cst_7 : f32 to vector<8x128xf32>
    %30 = arith.select %26, %28, %29 : vector<8x128xi1>, vector<8x128xf32>
    %c0_8 = arith.constant 0 : index
    %c0_9 = arith.constant 0 : index
    %c0_10 = arith.constant 0 : index
    %31 = vector.load %arg5[%c0_8, %c0_9, %c0_10] : memref<1x8x128xf32, #tpu.memory_space<vmem>>, vector<1x8x128xf32>
    %32 = vector.shape_cast %31 : vector<1x8x128xf32> to vector<8x128xf32>
    %33 = vector.shape_cast %30 : vector<8x128xf32> to vector<1x8x128xf32>
    tpu.vector_store %arg5[%c0_8, %c0_9, %c0_10], %33 {strides = array<i32>} : memref<1x8x128xf32, #tpu.memory_space<vmem>>, vector<1x8x128xf32>,
    return
  }
  func.func @transform_0(%arg0: i32, %arg1: i32, %arg2: memref<2xf32, #tpu.memory_space<smem>>) -> (i32, i32, i32) {
    %c0_i32 = arith.constant 0 : i32
    %c0_i32_0 = arith.constant 0 : i32
    return %arg0, %arg1, %c0_i32 : i32, i32, i32
  }
  func.func @transform_1(%arg0: i32, %arg1: i32, %arg2: memref<2xf32, #tpu.memory_space<smem>>) -> (i32, i32, i32) {
    %c0_i32 = arith.constant 0 : i32
    %c0_i32_0 = arith.constant 0 : i32
    return %arg0, %arg1, %c0_i32 : i32, i32, i32
  }
  func.func @transform_2(%arg0: i32, %arg1: i32, %arg2: memref<2xf32, #tpu.memory_space<smem>>) -> (i32, i32, i32) {
    %c0_i32 = arith.constant 0 : i32
    %c0_i32_0 = arith.constant 0 : i32
    return %arg0, %arg1, %c0_i32 : i32, i32, i32
  }
}

</mosaic_0001>

<bundles_post_ra>
// kernel: _vae_loss_details_impl.1
= control target key start
LH: loop header
LB: loop body
LE: loop exit
PB: predicated region body
PF: predicated region fallthrough
CT: control target
= control target key end

     0   :  { %s403_s15 = smov [#allocation3]   ;;  %s467_s0 = inlined_call_operand.vmem [shape: f32[2], index: 0, kind: input, shape index: {}]   ;;  %s468_s1 = inlined_call_operand.vmem [shape: f32[2,2,128], index: 1, kind: input, shape index: {}]   ;;  %s469_s2 = inlined_call_operand.vmem [shape: f32[2,2,128], index: 2, kind: input, shape index: {}]   ;;  %s470_s3 = inlined_call_operand.vmem [shape: f32[2,8,128], index: 3, kind: output, shape index: {}]  }
   0x1   :  { %s9_s14 = sshll.u32 %s467_s0, 4  ;;  %s10_s14 = int_to_ptr.vmem [resolvable:$true] %s9_s14 }
   0x2   :  { %12 = dma.vmem_to_smem %s10_s14, 16, %s403_s15, [#allocation2] }
   0x3   :  { %389 = dma.done.wait [#allocation2], 16 }
   0x4   :  { %390 = vsyncadd [#allocation2], 4294967280 }
   0x5   :  { %15 = sfence }
   0x6   :  { %s427_s16 = smov 0   ;;  %s429_s17 = smov 0  }
   0x7   :  { %s431_s18 = smov 0  }
   0x8 LB: > { %s33_s0 = sadd.s32 1, %s397_s17  ;;  %p331_p0 = scmp.ge.s32.totalorder %s401_s18, 1  ;;  %s401_s18 = sphi %s431_s18, %s21_s18   ;;  %s397_s17 = sphi %s429_s17, %s472_s17   ;;  %s393_s16 = sphi %s427_s16, %s471_s16  }
   0x9   : > { %p35_p1 = scmp.ge.s32.totalorder %s33_s0, 2  ;;  %p153_p2 = scmp.lt.s32.totalorder %s401_s18, 3 }
   0xb   : > { %s474_s0 = smov (%p35_p1, %s33_s0), 0  ;;  %p154_p3 = pnand %p331_p0, %p153_p2 }
   0xc   : > { %p186_p4 = scmp.lt.s32.totalorder (!%p154_p3), %s393_s16, 1  ;;  %s207_s19 = sld [smem:[#allocation3 + %s393_s16]] (!%p154_p3) }
   0xd   : > { %157 = sbr.rel (%p154_p3) target bundleno = 46 (0x2e), region = 28 }
  0x12   : > { %v218_v0 = vlaneseq  ;;  %s476_s16 = smov (!%p186_p4, %s393_s16), 1  ;;  %s208_s27 = smul.f32 8.0, %s207_s19  ;;  %vm227_vm0 = vcmask 1041408  }
  0x13   : > { %s332_s20 = sshll.u32 %s476_s16, 1  ;;  %s334_s4 = sshll.u32 %s476_s16, 3 }
  0x14   : > { %s192_s23 = scalar_lea.vmem %s468_s1, %s332_s20  ;;  %s199_s26 = scalar_lea.vmem %s469_s2, %s332_s20  ;;  %v219_v1 = vshrl.u32 %v218_v0, 7  ;;  %v222_v5 = vand.u32 127, %v218_v0 }
  0x15   : > { %v214_v2 = vld [vmem:[%s192_s23] sm:$0x3]  ;;  %s209_s28 = sceil.f32 %s208_s27  ;;  %s206_s7 = scalar_lea.vmem %s470_s3, %s334_s4 }
  0x16   : > { %v215_v3 = vld [vmem:[%s199_s26] sm:$0x3]  ;;  %s339_s29 = scvt.f32.s32 %s209_s28  ;;  %v220_v4 = vmul.u32 128, %v219_v1  ;;  %vm235_vm2 = vcmp.eq.s32.totalorder %v219_v1, 0 }
  0x17   : > { %v216_v6 = vsub.f32 %v214_v2, %v215_v3 }
  0x18   : > { %s335_s30 = sshll.u32 %s339_s29, 5  ;;  %v223_v7 = vadd.s32 %v222_v5, %v220_v4 }
  0x19   : > { %p212_p5 = scmp.lt.s32.totalorder %s335_s30, 256  ;;  %v217_v8 = vmul.f32 %v216_v6, %v216_v6 }
  0x1b   : > { %s478_s30 = smov (!%p212_p5, %s335_s30), 256 }
  0x1c   : > { %v224_v9 = vstv %s478_s30 }
  0x1d   : > { %vm225_vm1 = vcmp.lt.s32.totalorder %v223_v7, %v224_v9 }
  0x1e   : > { %v226_v10 = vsel %vm225_vm1, %v217_v8, 0.0 }
  0x1f   : > { %v228_v11 = vsel %vm227_vm0, %v226_v10, 0.0 }
  0x20   : > { %v229_v12 = vrot.slane %v228_v11, 4 }
  0x22   : > { %v230_v13 = vadd.f32 %v229_v12, %v228_v11 }
  0x24   : > { %v231_v14 = vrot.slane %v230_v13, 2 }
  0x26   : > { %v232_v15 = vadd.f32 %v231_v14, %v230_v13 }
  0x28   : > { %v233_v16 = vrot.slane %v232_v15, 1 }
  0x2a   : > { %v234_v17 = vadd.f32 %v233_v16, %v232_v15 }
  0x2c   : > { %v236_v18 = vsel %vm235_vm2, %v234_v17, 0.0 }
  0x2d   : > { %237 = vst [vmem:[%s206_s7] sm:$0xff] %v236_v18 }
  0x2e PF: > { %s21_s18 = sadd.s32 1, %s401_s18   ;;  %s471_s16 = smov %s397_s17 }
  0x2f   : > { %p18_p6 = scmp.ge.s32.totalorder %s21_s18, 4   ;;  %s472_s17 = smov %s474_s0 }
  0x31   :  { %20 = sbr.rel (!%p18_p6) target bundleno = 8 (0x8), region = 61 }

</bundles_post_ra>
